<compile_context>
chip_gen: v5e
topology: v5e:2x2
jax: 0.10.0
libtpu: 0.0.40
codegen_flags: <defaults>
</compile_context>

<pallas_src>
import functools

import jax
import jax.numpy as jnp
from jax.experimental import pallas as pl
from jax.experimental.pallas import tpu as pltpu


def _ensemble_kernel(x_ref, wc_ref, bc_ref, o_ref):
    # Single collapsed affine map: logits = x @ W_c + b_c  (one MXU push).
    logits = (
        jnp.dot(x_ref[...], wc_ref[...], preferred_element_type=jnp.float32)
        + bc_ref[...]
    )
    # Numerically-stable softmax over dim=1; exact divide (approx reciprocal
    # exceeded the 1e-4 tolerance).
    m = jnp.max(logits, axis=-1, keepdims=True)
    e = jnp.exp(logits - m)
    denom = jnp.sum(e, axis=-1, keepdims=True)
    o_ref[...] = (e / denom).astype(o_ref.dtype)


def fuse_ensemble_params(wa, ba, wb, bb, wf, bf):
    """Collapse modelA + modelB + fc1 into one affine map (exact up to fp rounding)."""
    w_c = (wa + wb) @ wf          # (in_features, n_out)
    b_c = (ba + bb) @ wf + bf     # (1, n_out)
    return w_c, b_c


@functools.partial(jax.jit, static_argnames=("tb",))
def my_ensemble_forward(x, w_c, b_c, *, tb=512):
    """x: (batch, in_features); w_c: (in_features, n_out); b_c: (1, n_out)."""
    batch, in_features = x.shape
    n_out = w_c.shape[1]

    # Single grid step for batch <= tb (tile == full batch dim, always legal);
    # otherwise tb-row tiles (tb is a multiple of 8) with a ragged last block.
    tile = min(tb, batch)
    grid = pl.cdiv(batch, tile)

    return pl.pallas_call(
        _ensemble_kernel,
        out_shape=jax.ShapeDtypeStruct((batch, n_out), jnp.float32),
        grid_spec=pltpu.PrefetchScalarGridSpec(
            num_scalar_prefetch=0,
            grid=(grid,),
            in_specs=[
                # x tiles stream through the pipeline (double-buffered DMA).
                pl.BlockSpec((tile, in_features), lambda i: (i, 0)),
                # Collapsed weight / bias stay VMEM-resident across all steps.
                pl.BlockSpec((in_features, n_out), lambda i: (0, 0)),
                pl.BlockSpec((1, n_out), lambda i: (0, 0)),
            ],
            out_specs=pl.BlockSpec((tile, n_out), lambda i: (i, 0)),
        ),
        compiler_params=pltpu.CompilerParams(
            dimension_semantics=("parallel",),
        ),
    )(x, w_c, b_c)


if __name__ == "__main__":
    key = jax.random.PRNGKey(0)
    k_x, k_wa, k_ba, k_wb, k_bb, k_wf, k_bf = jax.random.split(key, 7)

    batch = 256        # runs as a single grid step at tb=512
    in_features = 32   # input feature size to modelA / modelB
    hidden = 32        # output size of modelA / modelB == `input` arg of fc1
    n_classes = 4      # fc1 = nn.Linear(input, 4)

    x = jax.random.normal(k_x, (batch, in_features), dtype=jnp.float32)

    # modelA: Linear(in_features, hidden) -- stored as (in, out)
    wa = jax.random.normal(k_wa, (in_features, hidden), dtype=jnp.float32) * 0.1
    ba = jax.random.normal(k_ba, (1, hidden), dtype=jnp.float32) * 0.1
    # modelB: Linear(in_features, hidden)
    wb = jax.random.normal(k_wb, (in_features, hidden), dtype=jnp.float32) * 0.1
    bb = jax.random.normal(k_bb, (1, hidden), dtype=jnp.float32) * 0.1
    # fc1: Linear(hidden, 4)
    wf = jax.random.normal(k_wf, (hidden, n_classes), dtype=jnp.float32) * 0.1
    bf = jax.random.normal(k_bf, (1, n_classes), dtype=jnp.float32) * 0.1

    # Fuse the three linears ONCE, outside the per-call path.
    w_c, b_c = fuse_ensemble_params(wa, ba, wb, bb, wf, bf)

    out = my_ensemble_forward(x, w_c, b_c)
    jax.block_until_ready(out)

    # Pure-JAX reference: un-fused, exact branch order of the PyTorch module.
    ref = jax.nn.softmax(((x @ wa + ba) + (x @ wb + bb)) @ wf + bf, axis=1)

    assert out.shape == (batch, n_classes)
    assert jnp.allclose(out, ref, atol=1e-4), "mismatch vs JAX reference"
    assert jnp.allclose(jnp.sum(out, axis=1), 1.0, atol=1e-5)

    print("KERNEL_OK")
</pallas_src>

<mosaic_0001>
module attributes {stable_mosaic.version = 11 : i64} {
  func.func @_ensemble_kernel(%arg0: i32, %arg1: memref<256x32xf32, #tpu.memory_space<vmem>>, %arg2: memref<32x4xf32, #tpu.memory_space<vmem>>, %arg3: memref<1x4xf32, #tpu.memory_space<vmem>>, %arg4: memref<256x4xf32, #tpu.memory_space<vmem>>) attributes {dimension_semantics = [#tpu.dimension_semantics<parallel>], iteration_bounds = array<i64: 1>, scalar_prefetch = 0 : i64, scratch_operands = 0 : i64, tpu.core_type = #tpu.core_type<tc>, window_params = [{transform_indices = @transform_0, window_bounds = array<i64: 256, 32>}, {pipeline_mode = #tpu.pipeline_mode<synchronous>, transform_indices = @transform_1, window_bounds = array<i64: 32, 4>}, {pipeline_mode = #tpu.pipeline_mode<synchronous>, transform_indices = @transform_2, window_bounds = array<i64: 1, 4>}, {transform_indices = @transform_3, window_bounds = array<i64: 256, 4>}]} {
    %c0 = arith.constant 0 : index
    %c0_0 = arith.constant 0 : index
    %0 = vector.load %arg1[%c0, %c0_0] : memref<256x32xf32, #tpu.memory_space<vmem>>, vector<256x32xf32>
    %c0_1 = arith.constant 0 : index
    %c0_2 = arith.constant 0 : index
    %1 = vector.load %arg2[%c0_1, %c0_2] : memref<32x4xf32, #tpu.memory_space<vmem>>, vector<32x4xf32>
    %cst = arith.constant dense<0.000000e+00> : vector<256x4xf32>
    %2 = tpu.matmul %0, %1, %cst {dimension_numbers = #tpu.dot_dimension_numbers<[1], [0], [0], [1], [0, 0, 1, 1], [], []>} : vector<256x32xf32>, vector<32x4xf32>, vector<256x4xf32> -> vector<256x4xf32>
    %c0_3 = arith.constant 0 : index
    %c0_4 = arith.constant 0 : index
    %3 = vector.load %arg3[%c0_3, %c0_4] : memref<1x4xf32, #tpu.memory_space<vmem>>, vector<1x4xf32>
    %4 = vector.broadcast %3 : vector<1x4xf32> to vector<256x4xf32>
    %5 = arith.addf %2, %4 : vector<256x4xf32>
    %cst_5 = arith.constant dense<0xFF800000> : vector<256xf32>
    %6 = vector.multi_reduction <maximumf>, %5, %cst_5 [1] : vector<256x4xf32> to vector<256xf32>
    %7 = vector.shape_cast %6 : vector<256xf32> to vector<256x1xf32>
    %8 = vector.broadcast %7 : vector<256x1xf32> to vector<256x4xf32>
    %9 = arith.subf %5, %8 : vector<256x4xf32>
    %10 = math.exp %9 : vector<256x4xf32>
    %cst_6 = arith.constant dense<0.000000e+00> : vector<256xf32>
    %11 = vector.multi_reduction <add>, %10, %cst_6 [1] : vector<256x4xf32> to vector<256xf32>
    %12 = vector.shape_cast %11 : vector<256xf32> to vector<256x1xf32>
    %13 = vector.broadcast %12 : vector<256x1xf32> to vector<256x4xf32>
    %14 = arith.divf %10, %13 : vector<256x4xf32>
    %c0_7 = arith.constant 0 : index
    %c0_8 = arith.constant 0 : index
    %15 = vector.load %arg4[%c0_7, %c0_8] : memref<256x4xf32, #tpu.memory_space<vmem>>, vector<256x4xf32>
    tpu.vector_store %arg4[%c0_7, %c0_8], %14 {strides = array<i32>} : memref<256x4xf32, #tpu.memory_space<vmem>>, vector<256x4xf32>,
    return
  }
  func.func @transform_0(%arg0: i32) -> (i32, i32) {
    %c0_i32 = arith.constant 0 : i32
    %c0_i32_0 = arith.constant 0 : i32
    return %arg0, %c0_i32 : i32, i32
  }
  func.func @transform_1(%arg0: i32) -> (i32, i32) {
    %c0_i32 = arith.constant 0 : i32
    %c0_i32_0 = arith.constant 0 : i32
    %c0_i32_1 = arith.constant 0 : i32
    return %c0_i32, %c0_i32_0 : i32, i32
  }
  func.func @transform_2(%arg0: i32) -> (i32, i32) {
    %c0_i32 = arith.constant 0 : i32
    %c0_i32_0 = arith.constant 0 : i32
    %c0_i32_1 = arith.constant 0 : i32
    return %c0_i32, %c0_i32_0 : i32, i32
  }
  func.func @transform_3(%arg0: i32) -> (i32, i32) {
    %c0_i32 = arith.constant 0 : i32
    %c0_i32_0 = arith.constant 0 : i32
    return %arg0, %c0_i32 : i32, i32
  }
}

</mosaic_0001>

<bundles_post_ra>
// kernel: my_ensemble_forward.1
= control target key start
LH: loop header
LB: loop body
LE: loop exit
PB: predicated region body
PF: predicated region fallthrough
CT: control target
= control target key end

     0   :  { %vm54_vm0 = vcmask 261120   ;;  %vm264_vm1 = vcmask 31744   ;;  %s2228_s1 = inlined_call_operand.vmem [shape: f32[32,4], index: 1, kind: input, shape index: {}]   ;;  %s2229_s0 = inlined_call_operand.vmem [shape: f32[256,32], index: 0, kind: input, shape index: {}]   ;;  %s2230_s2 = inlined_call_operand.vmem [shape: f32[1,4], index: 2, kind: input, shape index: {}]   ;;  %s2231_s3 = inlined_call_operand.vmem [shape: f32[256,4], index: 3, kind: output, shape index: {}]  }
   0x1   :  { %v49_v0 = vld [vmem:[%s2228_s1 + $0x18] sm:$0xff]  ;;  %v48_v1 = vld [vmem:[%s2228_s1 + $0x10] sm:$0xff]  ;;  %v47_v2 = vld [vmem:[%s2228_s1 + $0x8] sm:$0xff] }
   0x2   :  { %163 = vmatpush.msra.mxu0 %v49_v0  ;;  %1101 = vmatpush.msra.mxu1 %v49_v0  ;;  %v46_v3 = vld [vmem:[%s2228_s1] sm:$0xff]  ;;  %v15_v8 = vld [vmem:[%s2229_s0 + $0x8] sm:$0xff]  ;;  %v16_v12 = vld [vmem:[%s2229_s0 + $0x10] sm:$0xff] }
   0x3   :  { %1102 = vmatpush.msra.mxu2 %v49_v0  ;;  %1103 = vmatpush.msra.mxu3 %v49_v0  ;;  %v14_v4 = vld [vmem:[%s2229_s0] sm:$0xff]  ;;  %v23_v9 = vld [vmem:[%s2229_s0 + $0x48] sm:$0xff]  ;;  %v24_v13 = vld [vmem:[%s2229_s0 + $0x50] sm:$0xff] }
   0x4   :  { %164 = vmatpush.msra.mxu0 %v48_v1  ;;  %1104 = vmatpush.msra.mxu1 %v48_v1  ;;  %v22_v5 = vld [vmem:[%s2229_s0 + $0x40] sm:$0xff]  ;;  %v31_v10 = vld [vmem:[%s2229_s0 + $0x88] sm:$0xff]  ;;  %v40_v14 = vld [vmem:[%s2229_s0 + $0xd0] sm:$0xff] }
   0x5   :  { %1105 = vmatpush.msra.mxu2 %v48_v1  ;;  %1106 = vmatpush.msra.mxu3 %v48_v1  ;;  %v30_v6 = vld [vmem:[%s2229_s0 + $0x80] sm:$0xff]  ;;  %v39_v11 = vld [vmem:[%s2229_s0 + $0xc8] sm:$0xff]  ;;  %v32_v15 = vld [vmem:[%s2229_s0 + $0x90] sm:$0xff] }
   0x6   :  { %165 = vmatpush.msra.mxu0 %v47_v2  ;;  %1107 = vmatpush.msra.mxu1 %v47_v2  ;;  %v38_v7 = vld [vmem:[%s2229_s0 + $0xc0] sm:$0xff]  ;;  %v17_v16 = vld [vmem:[%s2229_s0 + $0x18] sm:$0xff]  ;;  %v19_v24 = vld [vmem:[%s2229_s0 + $0x28] sm:$0xff] }
   0x7   :  { %1108 = vmatpush.msra.mxu2 %v47_v2  ;;  %1109 = vmatpush.msra.mxu3 %v47_v2  ;;  %v25_v17 = vld [vmem:[%s2229_s0 + $0x58] sm:$0xff]  ;;  %v18_v20 = vld [vmem:[%s2229_s0 + $0x20] sm:$0xff]  ;;  %v27_v25 = vld [vmem:[%s2229_s0 + $0x68] sm:$0xff] }
   0x8   :  { %166 = vmatpush.msra.mxu0 %v46_v3  ;;  %1110 = vmatpush.msra.mxu1 %v46_v3  ;;  %v33_v18 = vld [vmem:[%s2229_s0 + $0x98] sm:$0xff]  ;;  %v26_v21 = vld [vmem:[%s2229_s0 + $0x60] sm:$0xff]  ;;  %v35_v26 = vld [vmem:[%s2229_s0 + $0xa8] sm:$0xff] }
   0x9   :  { %1111 = vmatpush.msra.mxu2 %v46_v3  ;;  %1112 = vmatpush.msra.mxu3 %v46_v3  ;;  %v41_v19 = vld [vmem:[%s2229_s0 + $0xd8] sm:$0xff]  ;;  %v34_v22 = vld [vmem:[%s2229_s0 + $0xa0] sm:$0xff]  ;;  %v43_v27 = vld [vmem:[%s2229_s0 + $0xe8] sm:$0xff] }
   0xa   :  { %1069 = vmatmul.msk.f32.vlgmr.msra.gmra.mxu0 %vm54_vm0, %v14_v4  ;;  %1077 = vmatmul.msk.f32.vlgmr.msra.gmra.mxu1 %vm54_vm0, %v22_v5  ;;  %v42_v23 = vld [vmem:[%s2229_s0 + $0xe0] sm:$0xff]  ;;  %v20_v28 = vld [vmem:[%s2229_s0 + $0x30] sm:$0xff]  ;;  %v21_v32 = vld [vmem:[%s2229_s0 + $0x38] sm:$0xff] }
   0xb   :  { %1085 = vmatmul.msk.f32.vlgmr.msra.gmra.mxu2 %vm54_vm0, %v30_v6  ;;  %1093 = vmatmul.msk.f32.vlgmr.msra.gmra.mxu3 %vm54_vm0, %v38_v7  ;;  %v28_v29 = vld [vmem:[%s2229_s0 + $0x70] sm:$0xff]  ;;  %v29_v33 = vld [vmem:[%s2229_s0 + $0x78] sm:$0xff]  ;;  %v1405_v36 = vld [vmem:[%s2230_s2] ss:$0 sm:$0xff] }
   0xc   :  { %v36_v30 = vld [vmem:[%s2229_s0 + $0xb0] sm:$0xff]  ;;  %v37_v34 = vld [vmem:[%s2229_s0 + $0xb8] sm:$0xff] }
   0xd   :  { %v44_v31 = vld [vmem:[%s2229_s0 + $0xf0] sm:$0xff]  ;;  %v45_v35 = vld [vmem:[%s2229_s0 + $0xf8] sm:$0xff] }
  0x12   :  { %1070 = vmatmul.msk.f32.gmra.mxu0 %vm54_vm0, %v15_v8  ;;  %1078 = vmatmul.msk.f32.gmra.mxu1 %vm54_vm0, %v23_v9 }
  0x13   :  { %1086 = vmatmul.msk.f32.gmra.mxu2 %vm54_vm0, %v31_v10  ;;  %1094 = vmatmul.msk.f32.gmra.mxu3 %vm54_vm0, %v39_v11 }
  0x1a   :  { %1071 = vmatmul.msk.f32.gmra.mxu0 %vm54_vm0, %v16_v12  ;;  %1079 = vmatmul.msk.f32.gmra.mxu1 %vm54_vm0, %v24_v13 }
  0x1b   :  { %1095 = vmatmul.msk.f32.gmra.mxu3 %vm54_vm0, %v40_v14  ;;  %1087 = vmatmul.msk.f32.gmra.mxu2 %vm54_vm0, %v32_v15 }
  0x22   :  { %1072 = vmatmul.msk.f32.gmra.mxu0 %vm54_vm0, %v17_v16  ;;  %1080 = vmatmul.msk.f32.gmra.mxu1 %vm54_vm0, %v25_v17 }
  0x23   :  { %1088 = vmatmul.msk.f32.gmra.mxu2 %vm54_vm0, %v33_v18  ;;  %1096 = vmatmul.msk.f32.gmra.mxu3 %vm54_vm0, %v41_v19 }
  0x2a   :  { %1073 = vmatmul.msk.f32.gmra.mxu0 %vm54_vm0, %v18_v20  ;;  %1081 = vmatmul.msk.f32.gmra.mxu1 %vm54_vm0, %v26_v21 }
  0x2b   :  { %1089 = vmatmul.msk.f32.gmra.mxu2 %vm54_vm0, %v34_v22  ;;  %1097 = vmatmul.msk.f32.gmra.mxu3 %vm54_vm0, %v42_v23 }
  0x32   :  { %1074 = vmatmul.msk.f32.gmra.mxu0 %vm54_vm0, %v19_v24  ;;  %1082 = vmatmul.msk.f32.gmra.mxu1 %vm54_vm0, %v27_v25 }
  0x33   :  { %1090 = vmatmul.msk.f32.gmra.mxu2 %vm54_vm0, %v35_v26  ;;  %1098 = vmatmul.msk.f32.gmra.mxu3 %vm54_vm0, %v43_v27 }
  0x3a   :  { %1075 = vmatmul.msk.f32.gmra.mxu0 %vm54_vm0, %v20_v28  ;;  %1083 = vmatmul.msk.f32.gmra.mxu1 %vm54_vm0, %v28_v29 }
  0x3b   :  { %1091 = vmatmul.msk.f32.gmra.mxu2 %vm54_vm0, %v36_v30  ;;  %1099 = vmatmul.msk.f32.gmra.mxu3 %vm54_vm0, %v44_v31 }
  0x42   :  { %1076 = vmatmul.msk.f32.gmra.mxu0 %vm54_vm0, %v21_v32  ;;  %1084 = vmatmul.msk.f32.gmra.mxu1 %vm54_vm0, %v29_v33 }
  0x43   :  { %1092 = vmatmul.msk.f32.gmra.mxu2 %vm54_vm0, %v37_v34  ;;  %1100 = vmatmul.msk.f32.gmra.mxu3 %vm54_vm0, %v45_v35 }
  0x87   :  { %v168_v37 = vpop.f32.mrf.mxu0  ;;  %v192_v38 = vpop.f32.mrf.mxu1 }
  0x88   :  { %v1408_v39 = vadd.f32 %v1405_v36, %v168_v37  ;;  %v1411_v40 = vadd.f32 %v1405_v36, %v192_v38 }
  0x8a   :  { %v289_v41 = vsel %vm264_vm1, %v1411_v40, -inf  ;;  %v265_v42 = vsel %vm264_vm1, %v1408_v39, -inf }
  0x8b   :  { %290 = vmax.xlane.f32.xlu2 %v289_v41  ;;  %266 = vmax.xlane.f32.xlu0 %v265_v42 }
  0x8e   :  { %v216_v43 = vpop.f32.mrf.mxu2  ;;  %v240_v44 = vpop.f32.mrf.mxu3 }
  0x8f   :  { %v1418_v45 = vadd.f32 %v1405_v36, %v216_v43  ;;  %v1421_v46 = vadd.f32 %v1405_v36, %v240_v44  ;;  %v171_v47 = vpop.f32.mrf.mxu0  ;;  %v195_v48 = vpop.f32.mrf.mxu1 }
  0x90   :  { %v1428_v51 = vadd.f32 %v1405_v36, %v171_v47  ;;  %v1446_v62 = vadd.f32 %v1405_v36, %v195_v48 }
  0x91   :  { %v313_v49 = vsel %vm264_vm1, %v1418_v45, -inf  ;;  %v337_v50 = vsel %vm264_vm1, %v1421_v46, -inf }
  0x92   :  { %314 = vmax.xlane.f32.xlu1 %v313_v49  ;;  %v268_v60 = vsel %vm264_vm1, %v1428_v51, -inf  ;;  %v292_v6 = vsel %vm264_vm1, %v1446_v62, -inf }
  0x93   :  { %338 = vmax.xlane.f32.xlu0 %v337_v50 }
  0x96   :  { %v219_v52 = vpop.f32.mrf.mxu2  ;;  %v243_v53 = vpop.f32.mrf.mxu3 }
  0x97   :  { %v1431_v54 = vadd.f32 %v1405_v36, %v219_v52  ;;  %v1434_v55 = vadd.f32 %v1405_v36, %v243_v53  ;;  %v174_v56 = vpop.f32.mrf.mxu0  ;;  %v198_v57 = vpop.f32.mrf.mxu1 }
  0x98   :  { %v1443_v61 = vadd.f32 %v1405_v36, %v174_v56  ;;  %v1458_v7 = vadd.f32 %v1405_v36, %v198_v57 }
  0x99   :  { %v340_v58 = vsel %vm264_vm1, %v1434_v55, -inf  ;;  %v316_v59 = vsel %vm264_vm1, %v1431_v54, -inf }
  0x9a   :  { %341 = vmax.xlane.f32.xlu1 %v340_v58  ;;  %317 = vmax.xlane.f32.xlu2 %v316_v59  ;;  %v271_v2 = vsel %vm264_vm1, %v1443_v61, -inf  ;;  %v295_v12 = vsel %vm264_vm1, %v1458_v7, -inf }
  0x9b   :  { %269 = vmax.xlane.f32.xlu0 %v268_v60 }
  0x9e   :  { %v246_v63 = vpop.f32.mrf.mxu3  ;;  %v222_v0 = vpop.f32.mrf.mxu2 }
  0x9f   :  { %v1449_v1 = vadd.f32 %v1405_v36, %v246_v63  ;;  %v177_v3 = vpop.f32.mrf.mxu0  ;;  %v201_v4 = vpop.f32.mrf.mxu1  ;;  %v1464_v9 = vadd.f32 %v1405_v36, %v222_v0 }
  0xa0   :  { %v1461_v8 = vadd.f32 %v1405_v36, %v201_v4  ;;  %v1473_v16 = vadd.f32 %v1405_v36, %v177_v3 }
  0xa1   :  { %v343_v5 = vsel %vm264_vm1, %v1449_v1, -inf  ;;  %v319_v13 = vsel %vm264_vm1, %v1464_v9, -inf }
  0xa2   :  { %344 = vmax.xlane.f32.xlu2 %v343_v5  ;;  %272 = vmax.xlane.f32.xlu1 %v271_v2  ;;  %v298_v11 = vsel %vm264_vm1, %v1461_v8, -inf  ;;  %v274_v20 = vsel %vm264_vm1, %v1473_v16, -inf }
  0xa3   :  { %293 = vmax.xlane.f32.xlu0 %v292_v6 }
  0xa6   :  { %v225_v10 = vpop.f32.mrf.mxu2  ;;  %v249_v15 = vpop.f32.mrf.mxu3 }
  0xa7   :  { %v180_v14 = vpop.f32.mrf.mxu0  ;;  %v1479_v18 = vadd.f32 %v1405_v36, %v249_v15  ;;  %v204_v23 = vpop.f32.mrf.mxu1  ;;  %v1488_v24 = vadd.f32 %v1405_v36, %v225_v10 }
  0xa8   :  { %v1476_v17 = vadd.f32 %v1405_v36, %v180_v14  ;;  %v1494_v26 = vadd.f32 %v1405_v36, %v204_v23 }
  0xa9   :  { %v346_v21 = vsel %vm264_vm1, %v1479_v18, -inf  ;;  %v322_v29 = vsel %vm264_vm1, %v1488_v24, -inf }
  0xaa   :  { %299 = vmax.xlane.f32.xlu2 %v298_v11  ;;  %296 = vmax.xlane.f32.xlu1 %v295_v12  ;;  %v277_v19 = vsel %vm264_vm1, %v1476_v17, -inf  ;;  %v301_v30 = vsel %vm264_vm1, %v1494_v26, -inf }
  0xab   :  { %320 = vmax.xlane.f32.xlu0 %v319_v13 }
  0xae   :  { %v228_v22 = vpop.f32.mrf.mxu2  ;;  %v252_v27 = vpop.f32.mrf.mxu3 }
  0xaf   :  { %v1491_v25 = vadd.f32 %v1405_v36, %v228_v22  ;;  %v183_v31 = vpop.f32.mrf.mxu0  ;;  %v1506_v34 = vadd.f32 %v1405_v36, %v252_v27  ;;  %v207_v37 = vpop.f32.mrf.mxu1 }
  0xb0   :  { %v1503_v33 = vadd.f32 %v1405_v36, %v183_v31  ;;  %v1518_v47 = vadd.f32 %v1405_v36, %v207_v37 }
  0xb1   :  { %v325_v28 = vsel %vm264_vm1, %v1491_v25, -inf  ;;  %v349_v41 = vsel %vm264_vm1, %v1506_v34, -inf }
  0xb2   :  { %278 = vmax.xlane.f32.xlu2 %v277_v19  ;;  %275 = vmax.xlane.f32.xlu1 %v274_v20  ;;  %v280_v38 = vsel %vm264_vm1, %v1503_v33, -inf  ;;  %v304_v53 = vsel %vm264_vm1, %v1518_v47, -inf }
  0xb3   :  { %347 = vmax.xlane.f32.xlu0 %v346_v21 }
  0xb6   :  { %v231_v32 = vpop.f32.mrf.mxu2  ;;  %v255_v43 = vpop.f32.mrf.mxu3 }
  0xb7   :  { %v1509_v35 = vadd.f32 %v1405_v36, %v231_v32  ;;  %v186_v44 = vpop.f32.mrf.mxu0  ;;  %v1521_v48 = vadd.f32 %v1405_v36, %v255_v43  ;;  %v210_v57 = vpop.f32.mrf.mxu1 }
  0xb8   :  { %v1524_v49 = vadd.f32 %v1405_v36, %v186_v44  ;;  %v1533_v59 = vadd.f32 %v1405_v36, %v210_v57 }
  0xb9   :  { %v328_v42 = vsel %vm264_vm1, %v1509_v35, -inf  ;;  %v352_v52 = vsel %vm264_vm1, %v1521_v48, -inf }
  0xba   :  { %326 = vmax.xlane.f32.xlu2 %v325_v28  ;;  %323 = vmax.xlane.f32.xlu1 %v322_v29  ;;  %v283_v56 = vsel %vm264_vm1, %v1524_v49, -inf  ;;  %v307_v0 = vsel %vm264_vm1, %v1533_v59, -inf }
  0xbb   :  { %302 = vmax.xlane.f32.xlu0 %v301_v30 }
  0xbe   :  { %v234_v50 = vpop.f32.mrf.mxu2  ;;  %v258_v58 = vpop.f32.mrf.mxu3 }
  0xbf   :  { %v1536_v60 = vadd.f32 %v1405_v36, %v234_v50  ;;  %v1539_v63 = vadd.f32 %v1405_v36, %v258_v58  ;;  %v189_v4 = vpop.f32.mrf.mxu0  ;;  %v213_v6 = vpop.f32.mrf.mxu1 }
  0xc0   :  { %v1548_v10 = vadd.f32 %v1405_v36, %v189_v4  ;;  %v1554_v12 = vadd.f32 %v1405_v36, %v213_v6 }
  0xc1   :  { %v331_v2 = vsel %vm264_vm1, %v1536_v60, -inf  ;;  %v355_v3 = vsel %vm264_vm1, %v1539_v63, -inf }
  0xc2   :  { %281 = vmax.xlane.f32.xlu2 %v280_v38  ;;  %350 = vmax.xlane.f32.xlu1 %v349_v41  ;;  %v286_v14 = vsel %vm264_vm1, %v1548_v10, -inf  ;;  %v310_v15 = vsel %vm264_vm1, %v1554_v12, -inf }
  0xc3   :  { %329 = vmax.xlane.f32.xlu0 %v328_v42 }
  0xc6   :  { %v237_v5 = vpop.f32.mrf.mxu2  ;;  %v261_v19 = vpop.f32.mrf.mxu3 }
  0xc7   :  { %v1551_v11 = vadd.f32 %v1405_v36, %v237_v5  ;;  %v1563_v20 = vadd.f32 %v1405_v36, %v261_v19 }
  0xc9   :  { %v334_v13 = vsel %vm264_vm1, %v1551_v11, -inf  ;;  %v358_v21 = vsel %vm264_vm1, %v1563_v20, -inf }
  0xca   :  { %353 = vmax.xlane.f32.xlu2 %v352_v52  ;;  %305 = vmax.xlane.f32.xlu1 %v304_v53 }
  0xcb   :  { %284 = vmax.xlane.f32.xlu0 %v283_v56 }
  0xd2   :  { %308 = vmax.xlane.f32.xlu2 %v307_v0  ;;  %332 = vmax.xlane.f32.xlu1 %v331_v2 }
  0xd3   :  { %356 = vmax.xlane.f32.xlu0 %v355_v3 }
  0xda   :  { %335 = vmax.xlane.f32.xlu2 %v334_v13  ;;  %287 = vmax.xlane.f32.xlu1 %v286_v14 }
  0xdb   :  { %311 = vmax.xlane.f32.xlu0 %v310_v15 }
  0xe2   :  { %359 = vmax.xlane.f32.xlu1 %v358_v21 }
  0xfe   :  { %v291_v22 = vpop.xlane.xlu2 %290  ;;  %v267_v23 = vpop.xlane.xlu0 %266 }
  0xff   :  { %v369_v27 = vsub.f32 %v1411_v40, %v291_v22  ;;  %v361_v28 = vsub.f32 %v1408_v39, %v267_v23 }
 0x101   :  { %v409_v29 = vmul.f32 1.442695, %v369_v27  ;;  %v393_v30 = vmul.f32 1.442695, %v361_v28 }
 0x103   :  { %1114 = vpow2.f32 %v409_v29 }
 0x104   :  { %1116 = vpow2.f32 %v393_v30 }
 0x105   :  { %v315_v31 = vpop.xlane.xlu1 %314 }
 0x106   :  { %v377_v32 = vsub.f32 %v1418_v45, %v315_v31  ;;  %v339_v37 = vpop.xlane.xlu0 %338 }
 0x107   :  { %v385_v36 = vsub.f32 %v1421_v46, %v339_v37 }
 0x108   :  { %v425_v38 = vmul.f32 1.442695, %v377_v32 }
 0x109   :  { %v1571_v41 = vpop.eup %1114  ;;  %v441_v42 = vmul.f32 1.442695, %v385_v36 }
 0x10a   :  { %v1573_v43 = vpop.eup %1116  ;;  %1118 = vpow2.f32 %v425_v38  ;;  %v481_v39 = vsel %vm264_vm1, %v1571_v41, 0.0 }
 0x10b   :  { %1120 = vpow2.f32 %v441_v42  ;;  %482 = vadd.xlane.f32.xlu1 %v481_v39  ;;  %v457_v40 = vsel %vm264_vm1, %v1573_v43, 0.0 }
 0x10c   :  { %458 = vadd.xlane.f32.xlu2 %v457_v40 }
 0x10d   :  { %v342_v45 = vpop.xlane.xlu1 %341  ;;  %v318_v44 = vpop.xlane.xlu2 %317 }
 0x10e   :  { %v378_v46 = vsub.f32 %v1431_v54, %v318_v44  ;;  %v270_v50 = vpop.xlane.xlu0 %269  ;;  %v386_v2 = vsub.f32 %v1434_v55, %v342_v45 }
 0x10f   :  { %v362_v52 = vsub.f32 %v1428_v51, %v270_v50 }
 0x110   :  { %v1581_v53 = vpop.eup %1118  ;;  %v427_v56 = vmul.f32 1.442695, %v378_v46  ;;  %v443_v4 = vmul.f32 1.442695, %v386_v2 }
 0x111   :  { %v1583_v57 = vpop.eup %1120  ;;  %v395_v58 = vmul.f32 1.442695, %v362_v52  ;;  %v505_v0 = vsel %vm264_vm1, %v1581_v53, 0.0 }
 0x112   :  { %506 = vadd.xlane.f32.xlu0 %v505_v0  ;;  %v529_v3 = vsel %vm264_vm1, %v1583_v57, 0.0  ;;  %1122 = vpow2.f32 %v427_v56 }
 0x113   :  { %1124 = vpow2.f32 %v395_v58 }
 0x114   :  { %530 = vadd.xlane.f32.xlu2 %v529_v3  ;;  %1126 = vpow2.f32 %v443_v4 }
 0x115   :  { %v345_v54 = vpop.xlane.xlu2 %344  ;;  %v273_v51 = vpop.xlane.xlu1 %272 }
 0x116   :  { %v363_v5 = vsub.f32 %v1443_v61, %v273_v51  ;;  %v294_v6 = vpop.xlane.xlu0 %293  ;;  %v387_v55 = vsub.f32 %v1449_v1, %v345_v54 }
 0x117   :  { %v370_v13 = vsub.f32 %v1446_v62, %v294_v6 }
 0x118   :  { %v397_v14 = vmul.f32 1.442695, %v363_v5  ;;  %v1592_v15 = vpop.eup %1122  ;;  %v445_v62 = vmul.f32 1.442695, %v387_v55 }
 0x119   :  { %v411_v19 = vmul.f32 1.442695, %v370_v13  ;;  %v1595_v21 = vpop.eup %1124  ;;  %v508_v22 = vsel %vm264_vm1, %v1592_v15, 0.0 }
 0x11a   :  { %1128 = vpow2.f32 %v397_v14  ;;  %509 = vadd.xlane.f32.xlu1 %v508_v22  ;;  %v460_v61 = vsel %vm264_vm1, %v1595_v21, 0.0  ;;  %v1603_v30 = vpop.eup %1126 }
 0x11b   :  { %1130 = vpow2.f32 %v411_v19  ;;  %461 = vadd.xlane.f32.xlu0 %v460_v61 }
 0x11c   :  { %1132 = vpow2.f32 %v445_v62 }
 0x11d   :  { %v300_v23 = vpop.xlane.xlu2 %299  ;;  %v297_v27 = vpop.xlane.xlu1 %296 }
 0x11e   :  { %v371_v28 = vsub.f32 %v1458_v7, %v297_v27  ;;  %v321_v1 = vpop.xlane.xlu0 %320  ;;  %v372_v37 = vsub.f32 %v1461_v8, %v300_v23  ;;  %v532_v7 = vsel %vm264_vm1, %v1603_v30, 0.0 }
 0x11f   :  { %v379_v29 = vsub.f32 %v1464_v9, %v321_v1 }
 0x120   :  { %v413_v31 = vmul.f32 1.442695, %v371_v28  ;;  %v1605_v32 = vpop.eup %1128  ;;  %v415_v39 = vmul.f32 1.442695, %v372_v37 }
 0x121   :  { %v429_v36 = vmul.f32 1.442695, %v379_v29  ;;  %v1608_v38 = vpop.eup %1130  ;;  %v463_v42 = vsel %vm264_vm1, %v1605_v32, 0.0 }
 0x122   :  { %1134 = vpow2.f32 %v413_v31  ;;  %464 = vadd.xlane.f32.xlu1 %v463_v42  ;;  %v484_v9 = vsel %vm264_vm1, %v1608_v38, 0.0  ;;  %v1617_v46 = vpop.eup %1132 }
 0x123   :  { %1136 = vpow2.f32 %v429_v36  ;;  %533 = vadd.xlane.f32.xlu0 %v532_v7  ;;  %485 = vadd.xlane.f32.xlu2 %v484_v9  ;;  %v535_v0 = vsel %vm264_vm1, %v1617_v46, 0.0 }
 0x124   :  { %1138 = vpow2.f32 %v415_v39 }
 0x125   :  { %v279_v40 = vpop.xlane.xlu2 %278  ;;  %v276_v8 = vpop.xlane.xlu1 %275 }
 0x126   :  { %v364_v45 = vsub.f32 %v1473_v16, %v276_v8  ;;  %v348_v44 = vpop.xlane.xlu0 %347  ;;  %v365_v13 = vsub.f32 %v1476_v17, %v279_v40 }
 0x127   :  { %v388_v56 = vsub.f32 %v1479_v18, %v348_v44 }
 0x128   :  { %v399_v50 = vmul.f32 1.442695, %v364_v45  ;;  %v1619_v52 = vpop.eup %1134 }
 0x129   :  { %v1622_v58 = vpop.eup %1136  ;;  %v487_v2 = vsel %vm264_vm1, %v1619_v52, 0.0  ;;  %v447_v3 = vmul.f32 1.442695, %v388_v56 }
 0x12a   :  { %1140 = vpow2.f32 %v399_v50  ;;  %536 = vadd.xlane.f32.xlu1 %v535_v0  ;;  %v511_v16 = vsel %vm264_vm1, %v1622_v58, 0.0  ;;  %v1632_v6 = vpop.eup %1138 }
 0x12b   :  { %488 = vadd.xlane.f32.xlu0 %v487_v2  ;;  %512 = vadd.xlane.f32.xlu2 %v511_v16  ;;  %1142 = vpow2.f32 %v447_v3  ;;  %v490_v61 = vsel %vm264_vm1, %v1632_v6, 0.0 }
 0x12d   :  { %v327_v54 = vpop.xlane.xlu2 %326  ;;  %v324_v51 = vpop.xlane.xlu1 %323 }
 0x12e   :  { %v381_v18 = vsub.f32 %v1491_v25, %v327_v54  ;;  %v380_v4 = vsub.f32 %v1488_v24, %v324_v51  ;;  %v303_v5 = vpop.xlane.xlu0 %302  ;;  %v401_v25 = vmul.f32 1.442695, %v365_v13 }
 0x12f   :  { %v373_v22 = vsub.f32 %v1494_v26, %v303_v5 }
 0x130   :  { %v433_v14 = vmul.f32 1.442695, %v381_v18  ;;  %v431_v55 = vmul.f32 1.442695, %v380_v4  ;;  %v1635_v19 = vpop.eup %1140 }
 0x131   :  { %v466_v24 = vsel %vm264_vm1, %v1635_v19, 0.0  ;;  %v417_v62 = vmul.f32 1.442695, %v373_v22  ;;  %v1643_v1 = vpop.eup %1142 }
 0x132   :  { %1144 = vpow2.f32 %v433_v14  ;;  %491 = vadd.xlane.f32.xlu1 %v490_v61  ;;  %v538_v7 = vsel %vm264_vm1, %v1643_v1, 0.0 }
 0x133   :  { %1146 = vpow2.f32 %v431_v55  ;;  %467 = vadd.xlane.f32.xlu2 %v466_v24 }
 0x134   :  { %1148 = vpow2.f32 %v401_v25 }
 0x135   :  { %v282_v17 = vpop.xlane.xlu2 %281  ;;  %v351_v23 = vpop.xlane.xlu1 %350  ;;  %1150 = vpow2.f32 %v417_v62 }
 0x136   :  { %v366_v27 = vsub.f32 %v1503_v33, %v282_v17  ;;  %v330_v28 = vpop.xlane.xlu0 %329  ;;  %v389_v37 = vsub.f32 %v1506_v34, %v351_v23 }
 0x137   :  { %v382_v42 = vsub.f32 %v1509_v35, %v330_v28 }
 0x138   :  { %v1645_v26 = vpop.eup %1144  ;;  %v403_v29 = vmul.f32 1.442695, %v366_v27  ;;  %v449_v9 = vmul.f32 1.442695, %v389_v37 }
 0x139   :  { %v1647_v31 = vpop.eup %1146  ;;  %v517_v36 = vsel %vm264_vm1, %v1645_v26, 0.0  ;;  %v435_v34 = vmul.f32 1.442695, %v382_v42 }
 0x13a   :  { %1152 = vpow2.f32 %v403_v29  ;;  %v514_v33 = vsel %vm264_vm1, %v1647_v31, 0.0  ;;  %518 = vadd.xlane.f32.xlu1 %v517_v36  ;;  %v1657_v8 = vpop.eup %1148 }
 0x13b   :  { %515 = vadd.xlane.f32.xlu0 %v514_v33  ;;  %539 = vadd.xlane.f32.xlu2 %v538_v7  ;;  %v1659_v44 = vpop.eup %1150  ;;  %1154 = vpow2.f32 %v449_v9  ;;  %v469_v2 = vsel %vm264_vm1, %v1657_v8, 0.0 }
 0x13c   :  { %1156 = vpow2.f32 %v435_v34  ;;  %v493_v16 = vsel %vm264_vm1, %v1659_v44, 0.0 }
 0x13d   :  { %v354_v39 = vpop.xlane.xlu2 %353  ;;  %v306_v40 = vpop.xlane.xlu1 %305 }
 0x13e   :  { %v285_v45 = vpop.xlane.xlu0 %284  ;;  %v374_v35 = vsub.f32 %v1518_v47, %v306_v40  ;;  %v390_v28 = vsub.f32 %v1521_v48, %v354_v39 }
 0x13f   :  { %v367_v56 = vsub.f32 %v1524_v49, %v285_v45 }
 0x140   :  { %v1661_v50 = vpop.eup %1152  ;;  %v419_v3 = vmul.f32 1.442695, %v374_v35  ;;  %v451_v48 = vmul.f32 1.442695, %v390_v28 }
 0x141   :  { %v472_v0 = vsel %vm264_vm1, %v1661_v50, 0.0  ;;  %v405_v54 = vmul.f32 1.442695, %v367_v56  ;;  %v1672_v4 = vpop.eup %1154 }
 0x142   :  { %473 = vadd.xlane.f32.xlu1 %v472_v0  ;;  %v1674_v5 = vpop.eup %1156  ;;  %1158 = vpow2.f32 %v419_v3  ;;  %v541_v55 = vsel %vm264_vm1, %v1672_v4, 0.0 }
 0x143   :  { %470 = vadd.xlane.f32.xlu0 %v469_v2  ;;  %494 = vadd.xlane.f32.xlu2 %v493_v16  ;;  %1160 = vpow2.f32 %v405_v54  ;;  %v520_v22 = vsel %vm264_vm1, %v1674_v5, 0.0 }
 0x145   :  { %v309_v51 = vpop.xlane.xlu2 %308  ;;  %v333_v47 = vpop.xlane.xlu1 %332 }
 0x146   :  { %v375_v18 = vsub.f32 %v1533_v59, %v309_v51  ;;  %v357_v49 = vpop.xlane.xlu0 %356  ;;  %v383_v14 = vsub.f32 %v1536_v60, %v333_v47 }
 0x147   :  { %v391_v33 = vsub.f32 %v1539_v63, %v357_v49 }
 0x148   :  { %v421_v13 = vmul.f32 1.442695, %v375_v18  ;;  %v437_v59 = vmul.f32 1.442695, %v383_v14  ;;  %v1681_v25 = vpop.eup %1158 }
 0x149   :  { %v1684_v23 = vpop.eup %1160 }
 0x14a   :  { %1162 = vpow2.f32 %v421_v13 }
 0x14b   :  { %542 = vadd.xlane.f32.xlu0 %v541_v55  ;;  %521 = vadd.xlane.f32.xlu2 %v520_v22  ;;  %1164 = vpow2.f32 %v437_v59 }
 0x14d   :  { %v336_v61 = vpop.xlane.xlu2 %335  ;;  %v288_v24 = vpop.xlane.xlu1 %287 }
 0x14e   :  { %v384_v62 = vsub.f32 %v1551_v11, %v336_v61  ;;  %v312_v17 = vpop.xlane.xlu0 %311  ;;  %v368_v37 = vsub.f32 %v1548_v10, %v288_v24  ;;  %v496_v11 = vsel %vm264_vm1, %v1681_v25, 0.0  ;;  %v453_v10 = vmul.f32 1.442695, %v391_v33 }
 0x14f   :  { %v376_v60 = vsub.f32 %v1554_v12, %v312_v17  ;;  %v475_v12 = vsel %vm264_vm1, %v1684_v23, 0.0 }
 0x150   :  { %v1687_v27 = vpop.eup %1162  ;;  %v439_v29 = vmul.f32 1.442695, %v384_v62  ;;  %v407_v7 = vmul.f32 1.442695, %v368_v37 }
 0x151   :  { %v423_v36 = vmul.f32 1.442695, %v376_v60  ;;  %v499_v42 = vsel %vm264_vm1, %v1687_v27, 0.0  ;;  %v1698_v39 = vpop.eup %1164 }
 0x152   :  { %1166 = vpow2.f32 %v439_v29  ;;  %500 = vadd.xlane.f32.xlu1 %v499_v42  ;;  %v523_v35 = vsel %vm264_vm1, %v1698_v39, 0.0 }
 0x153   :  { %497 = vadd.xlane.f32.xlu0 %v496_v11  ;;  %1168 = vpow2.f32 %v423_v36  ;;  %476 = vadd.xlane.f32.xlu2 %v475_v12 }
 0x154   :  { %1170 = vpow2.f32 %v451_v48 }
 0x155   :  { %v360_v9 = vpop.xlane.xlu1 %359  ;;  %1172 = vpow2.f32 %v407_v7 }
 0x156   :  { %v392_v63 = vsub.f32 %v1563_v20, %v360_v9  ;;  %1174 = vpow2.f32 %v453_v10 }
 0x158   :  { %v1700_v40 = vpop.eup %1166  ;;  %v455_v0 = vmul.f32 1.442695, %v392_v63 }
 0x159   :  { %v526_v34 = vsel %vm264_vm1, %v1700_v40, 0.0  ;;  %v1705_v45 = vpop.eup %1168 }
 0x15a   :  { %527 = vadd.xlane.f32.xlu1 %v526_v34  ;;  %v502_v56 = vsel %vm264_vm1, %v1705_v45, 0.0  ;;  %v1711_v2 = vpop.eup %1170  ;;  %1176 = vpow2.f32 %v455_v0 }
 0x15b   :  { %524 = vadd.xlane.f32.xlu0 %v523_v35  ;;  %503 = vadd.xlane.f32.xlu2 %v502_v56  ;;  %v1713_v16 = vpop.eup %1172  ;;  %v544_v3 = vsel %vm264_vm1, %v1711_v2, 0.0 }
 0x15c   :  { %v1715_v20 = vpop.eup %1174  ;;  %v478_v54 = vsel %vm264_vm1, %v1713_v16, 0.0 }
 0x15d   :  { %v547_v51 = vsel %vm264_vm1, %v1715_v20, 0.0 }
 0x160   :  { %v1723_v47 = vpop.eup %1176 }
 0x161   :  { %v550_v18 = vsel %vm264_vm1, %v1723_v47, 0.0 }
 0x162   :  { %545 = vadd.xlane.f32.xlu1 %v544_v3 }
 0x163   :  { %479 = vadd.xlane.f32.xlu0 %v478_v54  ;;  %548 = vadd.xlane.f32.xlu2 %v547_v51 }
 0x16b   :  { %551 = vadd.xlane.f32.xlu0 %v550_v18 }
 0x17e   :  { %v483_v49 = vpop.xlane.xlu1 %482 }
 0x17f   :  { %1178 = vrcp.f32 %v483_v49  ;;  %v459_v13 = vpop.xlane.xlu2 %458  ;;  %v682_v17 = vand.u32 2147483647, %v483_v49  ;;  %v684_v60 = vand.u32 2147483648, %v483_v49  ;;  %vm678_vm4 = vweird.f32 %v483_v49 }
 0x180   :  { %1180 = vrcp.f32 %v459_v13  ;;  %v562_v37 = vand.u32 2147483647, %v459_v13  ;;  %v564_v36 = vand.u32 2147483648, %v459_v13  ;;  %vm558_vm5 = vweird.f32 %v459_v13 }
 0x181   :  { %vm683_vm7 = vcmp.eq.f32.partialorder %v682_v17, 8.507059e+37  ;;  %v685_v12 = vor.u32 1.1754944e-38, %v684_v60 }
 0x182   :  { %vm563_vm9 = vcmp.eq.f32.partialorder %v562_v37, 8.507059e+37  ;;  %v565_v63 = vor.u32 1.1754944e-38, %v564_v36 }
 0x185   :  { %v1179_v14 = vpop.eup %1178  ;;  %v507_v55 = vpop.xlane.xlu0 %506 }
 0x186   :  { %v1181_v22 = vpop.eup %1180  ;;  %v674_v59 = vmul.f32 %v1179_v14, %v483_v49  ;;  %1182 = vrcp.f32 %v507_v55  ;;  %vm679_vm2 = vweird.f32 %v1179_v14  ;;  %v802_v34 = vand.u32 2147483647, %v507_v55 }
 0x187   :  { %v554_v61 = vmul.f32 %v1181_v22, %v459_v13  ;;  %v1727_v24 = vpop.xlane.xlu2 %530  ;;  %vm559_vm3 = vweird.f32 %v1181_v22  ;;  %vm680_vm6 = vmor %vm678_vm4, %vm679_vm2  ;;  %v804_v13 = vand.u32 2147483648, %v507_v55  ;;  %vm798_vm11 = vweird.f32 %v507_v55 }
 0x188   :  { %v675_v62 = vsub.f32 1.0, %v674_v59  ;;  %1184 = vrcp.f32 %v1727_v24  ;;  %vm560_vm8 = vmor %vm558_vm5, %vm559_vm3  ;;  %vm803_vm14 = vcmp.eq.f32.partialorder %v802_v34, 8.507059e+37  ;;  %vm918_vm15 = vweird.f32 %v1727_v24 }
 0x189   :  { %v555_v28 = vsub.f32 1.0, %v554_v61  ;;  %v805_v17 = vor.u32 1.1754944e-38, %v804_v13 }
 0x18a   :  { %v676_v29 = vmul.f32 %v1179_v14, %v675_v62  ;;  %v922_v62 = vand.u32 2147483647, %v1727_v24 }
 0x18b   :  { %v556_v42 = vmul.f32 %v1181_v22, %v555_v28 }
 0x18c   :  { %v1183_v33 = vpop.eup %1182  ;;  %v677_v11 = vadd.f32 %v1179_v14, %v676_v29  ;;  %vm923_vm2 = vcmp.eq.f32.partialorder %v922_v62, 8.507059e+37 }
 0x18d   :  { %v557_v48 = vadd.f32 %v1181_v22, %v556_v42  ;;  %v794_v7 = vmul.f32 %v1183_v33, %v507_v55  ;;  %v1730_v35 = vpop.xlane.xlu1 %509  ;;  %vm799_vm10 = vweird.f32 %v1183_v33 }
 0x18e   :  { %v1185_v10 = vpop.eup %1184  ;;  %v681_v9 = vsel %vm680_vm6, %v1179_v14, %v677_v11  ;;  %v1733_v51 = vpop.xlane.xlu0 %461  ;;  %1186 = vrcp.f32 %v1730_v35  ;;  %vm800_vm13 = vmor %vm798_vm11, %vm799_vm10  ;;  %vm813_vm4 = vweird.f32 %v1730_v35 }
 0x18f   :  { %v686_v56 = vsel %vm683_vm7, %v685_v12, %v681_v9  ;;  %v561_v0 = vsel %vm560_vm8, %v1181_v22, %v557_v48  ;;  %v795_v3 = vsub.f32 1.0, %v794_v7  ;;  %v914_v54 = vmul.f32 %v1185_v10, %v1727_v24 }
 0x190   :  { %v687_v18 = vmul.f32 %v1571_v41, %v686_v56  ;;  %v566_v49 = vsel %vm563_vm9, %v565_v63, %v561_v0  ;;  %v924_v22 = vand.u32 2147483648, %v1727_v24  ;;  %1188 = vrcp.f32 %v1733_v51 }
 0x191   :  { %v567_v14 = vmul.f32 %v1573_v43, %v566_v49  ;;  %v796_v59 = vmul.f32 %v1183_v33, %v795_v3  ;;  %v915_v61 = vsub.f32 1.0, %v914_v54  ;;  %vm919_vm12 = vweird.f32 %v1185_v10 }
 0x192   :  { %1041 = vst.msk [vmem:[%s2231_s3 + $0x40] sm:$0xff] %vm264_vm1, %v687_v18  ;;  %vm920_vm0 = vmor %vm918_vm15, %vm919_vm12  ;;  %v925_v37 = vor.u32 1.1754944e-38, %v924_v22  ;;  %v817_v9 = vand.u32 2147483647, %v1730_v35  ;;  %v577_v56 = vand.u32 2147483647, %v1733_v51  ;;  %vm573_vm6 = vweird.f32 %v1733_v51 }
 0x193   :  { %1033 = vst.msk [vmem:[%s2231_s3] sm:$0xff] %vm264_vm1, %v567_v14  ;;  %v797_v41 = vadd.f32 %v1183_v33, %v796_v59  ;;  %v916_v43 = vmul.f32 %v1185_v10, %v915_v61  ;;  %v579_v0 = vand.u32 2147483648, %v1733_v51 }
 0x194   :  { %v1187_v55 = vpop.eup %1186  ;;  %vm1776_vm5 = vcmp.eq.f32.partialorder %v817_v9, 8.507059e+37  ;;  %vm1782_vm9 = vcmp.eq.f32.partialorder %v577_v56, 8.507059e+37 }
 0x195   :  { %v801_v60 = vsel %vm800_vm13, %v1183_v33, %v797_v41  ;;  %v917_v28 = vadd.f32 %v1185_v10, %v916_v43  ;;  %v1750_v36 = vpop.xlane.xlu1 %464  ;;  %v809_v12 = vmul.f32 %v1187_v55, %v1730_v35  ;;  %vm814_vm3 = vweird.f32 %v1187_v55 }
 0x196   :  { %v806_v29 = vsel %vm803_vm14, %v805_v17, %v801_v60  ;;  %v1754_v48 = vpop.xlane.xlu2 %485  ;;  %v1189_v7 = vpop.eup %1188  ;;  %1190 = vrcp.f32 %v1750_v36  ;;  %v592_v54 = vand.u32 2147483647, %v1750_v36  ;;  %vm815_vm8 = vmor %vm813_vm4, %vm814_vm3  ;;  %v580_v22 = vor.u32 1.1754944e-38, %v579_v0 }
 0x197   :  { %v807_v42 = vmul.f32 %v1581_v53, %v806_v29  ;;  %v921_v11 = vsel %vm920_vm0, %v1185_v10, %v917_v28  ;;  %v810_v53 = vsub.f32 1.0, %v809_v12  ;;  %v819_v10 = vand.u32 2147483648, %v1730_v35  ;;  %v1765_v34 = vpop.xlane.xlu0 %533 }
 0x198   :  { %v926_v33 = vsel %vm923_vm2, %v925_v37, %v921_v11  ;;  %v569_v63 = vmul.f32 %v1189_v7, %v1733_v51  ;;  %1192 = vrcp.f32 %v1754_v48  ;;  %vm574_vm7 = vweird.f32 %v1189_v7 }
 0x199   :  { %1049 = vst.msk [vmem:[%s2231_s3 + $0x80] sm:$0xff] %vm264_vm1, %v807_v42  ;;  %v927_v24 = vmul.f32 %v1583_v57, %v926_v33  ;;  %v811_v3 = vmul.f32 %v1187_v55, %v810_v53  ;;  %1194 = vrcp.f32 %v1765_v34  ;;  %v820_v13 = vor.u32 1.1754944e-38, %v819_v10  ;;  %vm575_vm13 = vmor %vm573_vm6, %vm574_vm7 }
 0x19a   :  { %v570_v57 = vsub.f32 1.0, %v569_v63  ;;  %vm588_vm10 = vweird.f32 %v1750_v36  ;;  %v594_v35 = vand.u32 2147483648, %v1750_v36  ;;  %vm1791_vm11 = vcmp.eq.f32.partialorder %v592_v54, 8.507059e+37 }
 0x19b   :  { %1057 = vst.msk [vmem:[%s2231_s3 + $0xc0] sm:$0xff] %vm264_vm1, %v927_v24  ;;  %v812_v49 = vadd.f32 %v1187_v55, %v811_v3  ;;  %vm693_vm12 = vweird.f32 %v1754_v48  ;;  %v699_v42 = vand.u32 2147483648, %v1754_v48  ;;  %v937_v51 = vand.u32 2147483647, %v1765_v34 }
 0x19c   :  { %v571_v14 = vmul.f32 %v1189_v7, %v570_v57  ;;  %v1191_v59 = vpop.eup %1190  ;;  %v595_v10 = vor.u32 1.1754944e-38, %v594_v35  ;;  %vm933_vm0 = vweird.f32 %v1765_v34  ;;  %v939_v57 = vand.u32 2147483648, %v1765_v34 }
 0x19d   :  { %v1788_v41 = vpop.xlane.xlu1 %536  ;;  %v816_v43 = vsel %vm815_vm8, %v1187_v55, %v812_v49  ;;  %v584_v17 = vmul.f32 %v1191_v59, %v1750_v36  ;;  %v697_v55 = vand.u32 2147483647, %v1754_v48  ;;  %vm589_vm14 = vweird.f32 %v1191_v59 }
 0x19e   :  { %v572_v62 = vadd.f32 %v1189_v7, %v571_v14  ;;  %v1796_v28 = vpop.xlane.xlu2 %512  ;;  %v1193_v29 = vpop.eup %1192  ;;  %v821_v37 = vsel %vm1776_vm5, %v820_v13, %v816_v43  ;;  %1196 = vrcp.f32 %v1788_v41  ;;  %vm590_vm3 = vmor %vm588_vm10, %vm589_vm14  ;;  %v700_v13 = vor.u32 1.1754944e-38, %v699_v42 }
 0x19f   :  { %v822_v11 = vmul.f32 %v1592_v15, %v821_v37  ;;  %v585_v33 = vsub.f32 1.0, %v584_v17  ;;  %v689_v9 = vmul.f32 %v1193_v29, %v1754_v48  ;;  %v1195_v24 = vpop.eup %1194  ;;  %v1817_v0 = vpop.xlane.xlu0 %488  ;;  %vm1819_vm15 = vcmp.eq.f32.partialorder %v697_v55, 8.507059e+37 }
 0x1a0   :  { %v576_v12 = vsel %vm575_vm13, %v1189_v7, %v572_v62  ;;  %v929_v56 = vmul.f32 %v1195_v24, %v1765_v34  ;;  %1198 = vrcp.f32 %v1796_v28  ;;  %vm694_vm2 = vweird.f32 %v1193_v29 }
 0x1a1   :  { %v581_v53 = vsel %vm1782_vm9, %v580_v22, %v576_v12  ;;  %1050 = vst.msk [vmem:[%s2231_s3 + $0x88] sm:$0xff] %vm264_vm1, %v822_v11  ;;  %v586_v15 = vmul.f32 %v1191_v59, %v585_v33  ;;  %v690_v7 = vsub.f32 1.0, %v689_v9  ;;  %vm934_vm4 = vweird.f32 %v1195_v24  ;;  %vm695_vm6 = vmor %vm693_vm12, %vm694_vm2 }
 0x1a2   :  { %v582_v63 = vmul.f32 %v1595_v21, %v581_v53  ;;  %v930_v18 = vsub.f32 1.0, %v929_v56  ;;  %vm1833_vm5 = vcmp.eq.f32.partialorder %v937_v51, 8.507059e+37  ;;  %1200 = vrcp.f32 %v1817_v0  ;;  %vm935_vm7 = vmor %vm933_vm0, %vm934_vm4 }
 0x1a3   :  { %v587_v21 = vadd.f32 %v1191_v59, %v586_v15  ;;  %v691_v54 = vmul.f32 %v1193_v29, %v690_v7  ;;  %v940_v36 = vor.u32 1.1754944e-38, %v939_v57  ;;  %v952_v37 = vand.u32 2147483647, %v1788_v41 }
 0x1a4   :  { %1034 = vst.msk [vmem:[%s2231_s3 + $0x8] sm:$0xff] %vm264_vm1, %v582_v63  ;;  %v1197_v49 = vpop.eup %1196  ;;  %v931_v43 = vmul.f32 %v1195_v24, %v930_v18  ;;  %v954_v55 = vand.u32 2147483648, %v1788_v41  ;;  %vm948_vm8 = vweird.f32 %v1788_v41  ;;  %v832_v56 = vand.u32 2147483647, %v1796_v28 }
 0x1a5   :  { %v1838_v61 = vpop.xlane.xlu1 %491  ;;  %v591_v22 = vsel %vm590_vm3, %v1191_v59, %v587_v21  ;;  %v692_v35 = vadd.f32 %v1193_v29, %v691_v54  ;;  %v944_v62 = vmul.f32 %v1197_v49, %v1788_v41  ;;  %vm949_vm9 = vweird.f32 %v1197_v49 }
 0x1a6   :  { %v596_v17 = vsel %vm1791_vm11, %v595_v10, %v591_v22  ;;  %v932_v12 = vadd.f32 %v1195_v24, %v931_v43  ;;  %v1848_v33 = vpop.xlane.xlu2 %467  ;;  %v1199_v9 = vpop.eup %1198  ;;  %1202 = vrcp.f32 %v1838_v61  ;;  %vm1865_vm10 = vcmp.eq.f32.partialorder %v952_v37, 8.507059e+37  ;;  %vm950_vm12 = vmor %vm948_vm8, %vm949_vm9 }
 0x1a7   :  { %v597_v42 = vmul.f32 %v1605_v32, %v596_v17  ;;  %v696_v11 = vsel %vm695_vm6, %v1193_v29, %v692_v35  ;;  %v945_v59 = vsub.f32 1.0, %v944_v62  ;;  %v824_v53 = vmul.f32 %v1199_v9, %v1796_v28 }
 0x1a8   :  { %v701_v60 = vsel %vm1819_vm15, %v700_v13, %v696_v11  ;;  %v936_v48 = vsel %vm935_vm7, %v1195_v24, %v932_v12  ;;  %v1201_v10 = vpop.eup %1200  ;;  %v955_v63 = vor.u32 1.1754944e-38, %v954_v55  ;;  %vm828_vm11 = vweird.f32 %v1796_v28 }
 0x1a9   :  { %1035 = vst.msk [vmem:[%s2231_s3 + $0x10] sm:$0xff] %vm264_vm1, %v597_v42  ;;  %v702_v32 = vmul.f32 %v1608_v38, %v701_v60  ;;  %v946_v29 = vmul.f32 %v1197_v49, %v945_v59  ;;  %v941_v34 = vsel %vm1833_vm5, %v940_v36, %v936_v48  ;;  %v825_v15 = vsub.f32 1.0, %v824_v53 }
 0x1aa   :  { %v942_v38 = vmul.f32 %v1603_v30, %v941_v34  ;;  %v704_v7 = vmul.f32 %v1201_v10, %v1817_v0  ;;  %vm829_vm13 = vweird.f32 %v1199_v9  ;;  %v834_v3 = vand.u32 2147483648, %v1796_v28 }
 0x1ab   :  { %1042 = vst.msk [vmem:[%s2231_s3 + $0x48] sm:$0xff] %vm264_vm1, %v702_v32  ;;  %v947_v24 = vadd.f32 %v1197_v49, %v946_v29  ;;  %vm708_vm14 = vweird.f32 %v1817_v0  ;;  %v826_v57 = vmul.f32 %v1199_v9, %v825_v15  ;;  %1204 = vrcp.f32 %v1848_v33  ;;  %vm830_vm0 = vmor %vm828_vm11, %vm829_vm13 }
 0x1ac   :  { %1058 = vst.msk [vmem:[%s2231_s3 + $0xc8] sm:$0xff] %vm264_vm1, %v942_v38  ;;  %v705_v21 = vsub.f32 1.0, %v704_v7  ;;  %v1203_v18 = vpop.eup %1202  ;;  %vm709_vm15 = vweird.f32 %v1201_v10  ;;  %v712_v14 = vand.u32 2147483647, %v1817_v0  ;;  %v714_v22 = vand.u32 2147483648, %v1817_v0 }
 0x1ad   :  { %v951_v30 = vsel %vm950_vm12, %v1197_v49, %v947_v24  ;;  %v1887_v54 = vpop.xlane.xlu1 %518  ;;  %v827_v49 = vadd.f32 %v1199_v9, %v826_v57  ;;  %v719_v62 = vmul.f32 %v1203_v18, %v1838_v61  ;;  %vm833_vm2 = vcmp.eq.f32.partialorder %v832_v56, 8.507059e+37  ;;  %vm710_vm3 = vmor %vm708_vm14, %vm709_vm15 }
 0x1ae   :  { %v1889_v41 = vpop.xlane.xlu0 %515  ;;  %v956_v13 = vsel %vm1865_vm10, %v955_v63, %v951_v30  ;;  %v706_v43 = vmul.f32 %v1201_v10, %v705_v21  ;;  %v835_v17 = vor.u32 1.1754944e-38, %v834_v3  ;;  %v727_v36 = vand.u32 2147483647, %v1838_v61  ;;  %v1907_v11 = vpop.xlane.xlu2 %539 }
 0x1af   :  { %v957_v35 = vmul.f32 %v1617_v46, %v956_v13  ;;  %1206 = vrcp.f32 %v1887_v54  ;;  %v831_v46 = vsel %vm830_vm0, %v1199_v9, %v827_v49  ;;  %v720_v55 = vsub.f32 1.0, %v719_v62 }
 0x1b0   :  { %v707_v37 = vadd.f32 %v1201_v10, %v706_v43  ;;  %v729_v42 = vand.u32 2147483648, %v1838_v61  ;;  %v836_v28 = vsel %vm833_vm2, %v835_v17, %v831_v46  ;;  %vm713_vm4 = vcmp.eq.f32.partialorder %v712_v14, 8.507059e+37 }
 0x1b1   :  { %1059 = vst.msk [vmem:[%s2231_s3 + $0xd0] sm:$0xff] %vm264_vm1, %v957_v35  ;;  %v715_v12 = vor.u32 1.1754944e-38, %v714_v22  ;;  %v1205_v59 = vpop.eup %1204  ;;  %v837_v60 = vmul.f32 %v1622_v58, %v836_v28  ;;  %v721_v48 = vmul.f32 %v1203_v18, %v720_v55  ;;  %vm724_vm5 = vweird.f32 %v1203_v18 }
 0x1b2   :  { %v711_v32 = vsel %vm710_vm3, %v1201_v10, %v707_v37  ;;  %vm723_vm6 = vweird.f32 %v1838_v61  ;;  %vm1914_vm7 = vcmp.eq.f32.partialorder %v727_v36, 8.507059e+37  ;;  %v599_v53 = vmul.f32 %v1205_v59, %v1848_v33 }
 0x1b3   :  { %v716_v9 = vsel %vm713_vm4, %v715_v12, %v711_v32  ;;  %1051 = vst.msk [vmem:[%s2231_s3 + $0x90] sm:$0xff] %vm264_vm1, %v837_v60  ;;  %v722_v58 = vadd.f32 %v1203_v18, %v721_v48  ;;  %v730_v10 = vor.u32 1.1754944e-38, %v729_v42  ;;  %1208 = vrcp.f32 %v1889_v41  ;;  %vm725_vm8 = vmor %vm723_vm6, %vm724_vm5 }
 0x1b4   :  { %v717_v0 = vmul.f32 %v1619_v52, %v716_v9  ;;  %v600_v61 = vsub.f32 1.0, %v599_v53  ;;  %vm603_vm9 = vweird.f32 %v1848_v33  ;;  %v607_v51 = vand.u32 2147483647, %v1848_v33 }
 0x1b5   :  { %v1207_v34 = vpop.eup %1206  ;;  %v609_v63 = vand.u32 2147483648, %v1848_v33  ;;  %v726_v38 = vsel %vm725_vm8, %v1203_v18, %v722_v58  ;;  %v862_v24 = vand.u32 2147483647, %v1887_v54  ;;  %1210 = vrcp.f32 %v1907_v11  ;;  %v1935_v15 = vpop.xlane.xlu1 %473 }
 0x1b6   :  { %1043 = vst.msk [vmem:[%s2231_s3 + $0x50] sm:$0xff] %vm264_vm1, %v717_v0  ;;  %v854_v52 = vmul.f32 %v1207_v34, %v1887_v54  ;;  %v1937_v7 = vpop.xlane.xlu0 %470  ;;  %v731_v56 = vsel %vm1914_vm7, %v730_v10, %v726_v38  ;;  %v601_v3 = vmul.f32 %v1205_v59, %v600_v61  ;;  %vm604_vm10 = vweird.f32 %v1205_v59  ;;  %v1961_v62 = vpop.xlane.xlu2 %494 }
 0x1b7   :  { %v864_v30 = vand.u32 2147483648, %v1887_v54  ;;  %v732_v57 = vmul.f32 %v1632_v6, %v731_v56  ;;  %v847_v18 = vand.u32 2147483647, %v1889_v41  ;;  %v849_v13 = vand.u32 2147483648, %v1889_v41  ;;  %vm605_vm13 = vmor %vm603_vm9, %vm604_vm10 }
 0x1b8   :  { %v855_v21 = vsub.f32 1.0, %v854_v52  ;;  %v602_v14 = vadd.f32 %v1205_v59, %v601_v3  ;;  %vm1945_vm11 = vcmp.eq.f32.partialorder %v607_v51, 8.507059e+37  ;;  %vm858_vm12 = vweird.f32 %v1887_v54 }
 0x1b9   :  { %1212 = vrcp.f32 %v1935_v15  ;;  %v1209_v35 = vpop.eup %1208  ;;  %1044 = vst.msk [vmem:[%s2231_s3 + $0x58] sm:$0xff] %vm264_vm1, %v732_v57  ;;  %v610_v6 = vor.u32 1.1754944e-38, %v609_v63  ;;  %vm859_vm14 = vweird.f32 %v1207_v34  ;;  %vm1957_vm15 = vcmp.eq.f32.partialorder %v862_v24, 8.507059e+37 }
 0x1ba   :  { %v856_v49 = vmul.f32 %v1207_v34, %v855_v21  ;;  %v606_v17 = vsel %vm605_vm13, %v1205_v59, %v602_v14  ;;  %v865_v36 = vor.u32 1.1754944e-38, %v864_v30  ;;  %v839_v46 = vmul.f32 %v1209_v35, %v1889_v41  ;;  %vm860_vm3 = vmor %vm858_vm12, %vm859_vm14 }
 0x1bb   :  { %vm843_vm0 = vweird.f32 %v1889_v41  ;;  %v1211_v37 = vpop.eup %1210  ;;  %v611_v33 = vsel %vm1945_vm11, %v610_v6, %v606_v17  ;;  %vm1967_vm2 = vcmp.eq.f32.partialorder %v847_v18, 8.507059e+37  ;;  %v850_v28 = vor.u32 1.1754944e-38, %v849_v13 }
 0x1bc   :  { %v857_v55 = vadd.f32 %v1207_v34, %v856_v49  ;;  %v612_v12 = vmul.f32 %v1635_v19, %v611_v33  ;;  %v840_v59 = vsub.f32 1.0, %v839_v46  ;;  %v959_v60 = vmul.f32 %v1211_v37, %v1907_v11 }
 0x1bd   :  { %vm963_vm4 = vweird.f32 %v1907_v11  ;;  %v967_v48 = vand.u32 2147483647, %v1907_v11  ;;  %v969_v9 = vand.u32 2147483648, %v1907_v11  ;;  %1214 = vrcp.f32 %v1937_v7 }
 0x1be   :  { %v861_v32 = vsel %vm860_vm3, %v1207_v34, %v857_v55  ;;  %1036 = vst.msk [vmem:[%s2231_s3 + $0x18] sm:$0xff] %vm264_vm1, %v612_v12  ;;  %v841_v54 = vmul.f32 %v1209_v35, %v840_v59  ;;  %vm844_vm5 = vweird.f32 %v1209_v35  ;;  %v960_v53 = vsub.f32 1.0, %v959_v60  ;;  %v1989_v34 = vpop.xlane.xlu0 %542  ;;  %v2010_v18 = vpop.xlane.xlu2 %521 }
 0x1bf   :  { %v1213_v29 = vpop.eup %1212  ;;  %v866_v19 = vsel %vm1957_vm15, %v865_v36, %v861_v32  ;;  %vm633_vm6 = vweird.f32 %v1935_v15  ;;  %v637_v10 = vand.u32 2147483647, %v1935_v15  ;;  %vm964_vm7 = vweird.f32 %v1211_v37  ;;  %vm845_vm8 = vmor %vm843_vm0, %vm844_vm5 }
 0x1c0   :  { %v867_v0 = vmul.f32 %v1645_v26, %v866_v19  ;;  %v629_v58 = vmul.f32 %v1213_v29, %v1935_v15  ;;  %v842_v61 = vadd.f32 %v1209_v35, %v841_v54  ;;  %v961_v51 = vmul.f32 %v1211_v37, %v960_v53  ;;  %vm965_vm10 = vmor %vm963_vm4, %vm964_vm7 }
 0x1c1   :  { %1216 = vrcp.f32 %v1961_v62  ;;  %vm1998_vm9 = vcmp.eq.f32.partialorder %v967_v48, 8.507059e+37  ;;  %v970_v63 = vor.u32 1.1754944e-38, %v969_v9  ;;  %v639_v52 = vand.u32 2147483648, %v1935_v15 }
 0x1c2   :  { %1053 = vst.msk [vmem:[%s2231_s3 + $0xa0] sm:$0xff] %vm264_vm1, %v867_v0  ;;  %v630_v38 = vsub.f32 1.0, %v629_v58  ;;  %v846_v24 = vsel %vm845_vm8, %v1209_v35, %v842_v61  ;;  %v962_v56 = vadd.f32 %v1211_v37, %v961_v51  ;;  %v622_v3 = vand.u32 2147483647, %v1937_v7 }
 0x1c3   :  { %1218 = vrcp.f32 %v1989_v34  ;;  %v1215_v30 = vpop.eup %1214  ;;  %v851_v57 = vsel %vm1967_vm2, %v850_v28, %v846_v24  ;;  %vm634_vm11 = vweird.f32 %v1213_v29  ;;  %v624_v21 = vand.u32 2147483648, %v1937_v7 }
 0x1c4   :  { %v631_v41 = vmul.f32 %v1213_v29, %v630_v38  ;;  %v852_v13 = vmul.f32 %v1647_v31, %v851_v57  ;;  %v966_v14 = vsel %vm965_vm10, %v1211_v37, %v962_v56  ;;  %vm2013_vm12 = vcmp.eq.f32.partialorder %v637_v10, 8.507059e+37  ;;  %vm635_vm14 = vmor %vm633_vm6, %vm634_vm11 }
 0x1c5   :  { %v614_v35 = vmul.f32 %v1215_v30, %v1937_v7  ;;  %v971_v6 = vsel %vm1998_vm9, %v970_v63, %v966_v14  ;;  %v640_v49 = vor.u32 1.1754944e-38, %v639_v52  ;;  %vm618_vm13 = vweird.f32 %v1937_v7  ;;  %v2035_v55 = vpop.xlane.xlu1 %500 }
 0x1c6   :  { %v632_v11 = vadd.f32 %v1213_v29, %v631_v41  ;;  %1052 = vst.msk [vmem:[%s2231_s3 + $0x98] sm:$0xff] %vm264_vm1, %v852_v13  ;;  %v972_v31 = vmul.f32 %v1643_v1, %v971_v6  ;;  %vm2028_vm15 = vcmp.eq.f32.partialorder %v622_v3, 8.507059e+37  ;;  %1220 = vrcp.f32 %v2010_v18  ;;  %v2047_v48 = vpop.xlane.xlu0 %497  ;;  %v2067_v26 = vpop.xlane.xlu2 %476 }
 0x1c7   :  { %v1217_v43 = vpop.eup %1216  ;;  %v615_v17 = vsub.f32 1.0, %v614_v35  ;;  %v625_v37 = vor.u32 1.1754944e-38, %v624_v21  ;;  %vm738_vm0 = vweird.f32 %v1961_v62  ;;  %vm619_vm2 = vweird.f32 %v1215_v30 }
 0x1c8   :  { %v636_v46 = vsel %vm635_vm14, %v1213_v29, %v632_v11  ;;  %v734_v33 = vmul.f32 %v1217_v43, %v1961_v62  ;;  %1060 = vst.msk [vmem:[%s2231_s3 + $0xd8] sm:$0xff] %vm264_vm1, %v972_v31  ;;  %v742_v28 = vand.u32 2147483647, %v1961_v62  ;;  %v744_v60 = vand.u32 2147483648, %v1961_v62  ;;  %vm620_vm4 = vmor %vm618_vm13, %vm619_vm2 }
 0x1c9   :  { %v1219_v42 = vpop.eup %1218  ;;  %v641_v1 = vsel %vm2013_vm12, %v640_v49, %v636_v46  ;;  %v616_v15 = vmul.f32 %v1215_v30, %v615_v17  ;;  %vm978_vm3 = vweird.f32 %v1989_v34  ;;  %v982_v29 = vand.u32 2147483647, %v1989_v34 }
 0x1ca   :  { %v642_v12 = vmul.f32 %v1661_v50, %v641_v1  ;;  %v735_v59 = vsub.f32 1.0, %v734_v33  ;;  %v974_v32 = vmul.f32 %v1219_v42, %v1989_v34  ;;  %1222 = vrcp.f32 %v2035_v55 }
 0x1cb   :  { %v617_v9 = vadd.f32 %v1215_v30, %v616_v15  ;;  %vm739_vm5 = vweird.f32 %v1217_v43  ;;  %v984_v54 = vand.u32 2147483648, %v1989_v34  ;;  %vm2059_vm6 = vcmp.eq.f32.partialorder %v742_v28, 8.507059e+37 }
 0x1cc   :  { %1038 = vst.msk [vmem:[%s2231_s3 + $0x28] sm:$0xff] %vm264_vm1, %v642_v12  ;;  %v736_v50 = vmul.f32 %v1217_v43, %v735_v59  ;;  %v975_v19 = vsub.f32 1.0, %v974_v32  ;;  %v1221_v53 = vpop.eup %1220  ;;  %vm979_vm7 = vweird.f32 %v1219_v42  ;;  %1224 = vrcp.f32 %v2047_v48  ;;  %vm740_vm8 = vmor %vm738_vm0, %vm739_vm5 }
 0x1cd   :  { %v621_v0 = vsel %vm620_vm4, %v1215_v30, %v617_v9  ;;  %v869_v51 = vmul.f32 %v1221_v53, %v2010_v18  ;;  %v745_v38 = vor.u32 1.1754944e-38, %v744_v60  ;;  %vm2072_vm9 = vcmp.eq.f32.partialorder %v982_v29, 8.507059e+37  ;;  %vm980_vm10 = vmor %vm978_vm3, %vm979_vm7  ;;  %v2098_v49 = vpop.xlane.xlu1 %527 }
 0x1ce   :  { %v626_v10 = vsel %vm2028_vm15, %v625_v37, %v621_v0  ;;  %v737_v61 = vadd.f32 %v1217_v43, %v736_v50  ;;  %v976_v7 = vmul.f32 %v1219_v42, %v975_v19  ;;  %v877_v24 = vand.u32 2147483647, %v2010_v18 }
 0x1cf   :  { %v627_v63 = vmul.f32 %v1657_v8, %v626_v10  ;;  %v985_v30 = vor.u32 1.1754944e-38, %v984_v54  ;;  %v870_v57 = vsub.f32 1.0, %v869_v51  ;;  %vm874_vm11 = vweird.f32 %v1221_v53 }
 0x1d0   :  { %v741_v56 = vsel %vm740_vm8, %v1217_v43, %v737_v61  ;;  %v977_v3 = vadd.f32 %v1219_v42, %v976_v7  ;;  %v1223_v41 = vpop.eup %1222  ;;  %v879_v62 = vand.u32 2147483648, %v2010_v18  ;;  %1226 = vrcp.f32 %v2067_v26 }
 0x1d1   :  { %1037 = vst.msk [vmem:[%s2231_s3 + $0x20] sm:$0xff] %vm264_vm1, %v627_v63  ;;  %v746_v8 = vsel %vm2059_vm6, %v745_v38, %v741_v56  ;;  %v871_v14 = vmul.f32 %v1221_v53, %v870_v57  ;;  %v764_v22 = vmul.f32 %v1223_v41, %v2035_v55  ;;  %vm873_vm12 = vweird.f32 %v2010_v18  ;;  %v2106_v18 = vpop.xlane.xlu0 %524 }
 0x1d2   :  { %v747_v21 = vmul.f32 %v1659_v44, %v746_v8  ;;  %v981_v13 = vsel %vm980_vm10, %v1219_v42, %v977_v3  ;;  %v1225_v35 = vpop.eup %1224  ;;  %vm2093_vm13 = vcmp.eq.f32.partialorder %v877_v24, 8.507059e+37  ;;  %v772_v11 = vand.u32 2147483647, %v2035_v55  ;;  %vm875_vm14 = vmor %vm873_vm12, %vm874_vm11 }
 0x1d3   :  { %v986_v6 = vsel %vm2072_vm9, %v985_v30, %v981_v13  ;;  %v872_v43 = vadd.f32 %v1221_v53, %v871_v14  ;;  %v765_v31 = vsub.f32 1.0, %v764_v22  ;;  %v749_v17 = vmul.f32 %v1225_v35, %v2047_v48 }
 0x1d4   :  { %1045 = vst.msk [vmem:[%s2231_s3 + $0x60] sm:$0xff] %vm264_vm1, %v747_v21  ;;  %v987_v44 = vmul.f32 %v1672_v4, %v986_v6  ;;  %v880_v36 = vor.u32 1.1754944e-38, %v879_v62  ;;  %vm769_vm15 = vweird.f32 %v1223_v41  ;;  %v774_v46 = vand.u32 2147483648, %v2035_v55 }
 0x1d5   :  { %v757_v37 = vand.u32 2147483647, %v2047_v48  ;;  %v876_v4 = vsel %vm875_vm14, %v1221_v53, %v872_v43  ;;  %v766_v33 = vmul.f32 %v1223_v41, %v765_v31  ;;  %v750_v42 = vsub.f32 1.0, %v749_v17  ;;  %v2136_v63 = vpop.xlane.xlu1 %545 }
 0x1d6   :  { %1061 = vst.msk [vmem:[%s2231_s3 + $0xe0] sm:$0xff] %vm264_vm1, %v987_v44  ;;  %1228 = vrcp.f32 %v2098_v49  ;;  %v1227_v1 = vpop.eup %1226  ;;  %v881_v15 = vsel %vm2093_vm13, %v880_v36, %v876_v4  ;;  %vm768_vm0 = vweird.f32 %v2035_v55  ;;  %vm754_vm2 = vweird.f32 %v1225_v35 }
 0x1d7   :  { %v759_v28 = vand.u32 2147483648, %v2047_v48  ;;  %v882_v12 = vmul.f32 %v1674_v5, %v881_v15  ;;  %v767_v59 = vadd.f32 %v1223_v41, %v766_v33  ;;  %v751_v60 = vmul.f32 %v1225_v35, %v750_v42  ;;  %vm770_vm3 = vmor %vm768_vm0, %vm769_vm15 }
 0x1d8   :  { %v644_v32 = vmul.f32 %v1227_v1, %v2067_v26  ;;  %vm773_vm4 = vcmp.eq.f32.partialorder %v772_v11, 8.507059e+37  ;;  %v775_v9 = vor.u32 1.1754944e-38, %v774_v46  ;;  %vm753_vm5 = vweird.f32 %v2047_v48  ;;  %v2132_v48 = vpop.xlane.xlu2 %503 }
 0x1d9   :  { %1230 = vrcp.f32 %v2106_v18  ;;  %1054 = vst.msk [vmem:[%s2231_s3 + $0xa8] sm:$0xff] %vm264_vm1, %v882_v12  ;;  %v771_v55 = vsel %vm770_vm3, %v1223_v41, %v767_v59  ;;  %v752_v29 = vadd.f32 %v1225_v35, %v751_v60  ;;  %vm758_vm6 = vcmp.eq.f32.partialorder %v757_v37, 8.507059e+37  ;;  %vm755_vm7 = vmor %vm753_vm5, %vm754_vm2 }
 0x1da   :  { %v645_v5 = vsub.f32 1.0, %v644_v32  ;;  %v776_v50 = vsel %vm773_vm4, %v775_v9, %v771_v55  ;;  %v760_v19 = vor.u32 1.1754944e-38, %v759_v28  ;;  %v652_v54 = vand.u32 2147483647, %v2067_v26 }
 0x1db   :  { %v654_v53 = vand.u32 2147483648, %v2067_v26  ;;  %v777_v58 = vmul.f32 %v1687_v27, %v776_v50  ;;  %v756_v10 = vsel %vm755_vm7, %v1225_v35, %v752_v29  ;;  %vm649_vm8 = vweird.f32 %v1227_v1  ;;  %v2145_v27 = vpop.xlane.xlu0 %479 }
 0x1dc   :  { %v1229_v0 = vpop.eup %1228  ;;  %v646_v61 = vmul.f32 %v1227_v1, %v645_v5  ;;  %v761_v7 = vsel %vm758_vm6, %v760_v19, %v756_v10  ;;  %vm648_vm9 = vweird.f32 %v2067_v26  ;;  %1232 = vrcp.f32 %v2132_v48 }
 0x1dd   :  { %v899_v51 = vmul.f32 %v1229_v0, %v2098_v49  ;;  %1047 = vst.msk [vmem:[%s2231_s3 + $0x70] sm:$0xff] %vm264_vm1, %v777_v58  ;;  %v762_v38 = vmul.f32 %v1681_v25, %v761_v7  ;;  %vm650_vm10 = vmor %vm648_vm9, %vm649_vm8  ;;  %vm653_vm11 = vcmp.eq.f32.partialorder %v652_v54, 8.507059e+37  ;;  %v655_v56 = vor.u32 1.1754944e-38, %v654_v53 }
 0x1de   :  { %v647_v52 = vadd.f32 %v1227_v1, %v646_v61  ;;  %v909_v25 = vand.u32 2147483648, %v2098_v49  ;;  %1234 = vrcp.f32 %v2136_v63  ;;  %vm904_vm12 = vweird.f32 %v1229_v0 }
 0x1df   :  { %v1231_v24 = vpop.eup %1230  ;;  %v900_v3 = vsub.f32 1.0, %v899_v51  ;;  %1046 = vst.msk [vmem:[%s2231_s3 + $0x68] sm:$0xff] %vm264_vm1, %v762_v38  ;;  %v907_v8 = vand.u32 2147483647, %v2098_v49  ;;  %v892_v13 = vand.u32 2147483647, %v2106_v18  ;;  %vm903_vm13 = vweird.f32 %v2098_v49 }
 0x1e0   :  { %v651_v30 = vsel %vm650_vm10, %v1227_v1, %v647_v52  ;;  %v884_v57 = vmul.f32 %v1231_v24, %v2106_v18  ;;  %v894_v14 = vand.u32 2147483648, %v2106_v18  ;;  %1236 = vrcp.f32 %v2145_v27  ;;  %vm905_vm14 = vmor %vm903_vm13, %vm904_vm12  ;;  %v2166_v44 = vpop.xlane.xlu2 %548 }
 0x1e1   :  { %v656_v26 = vsel %vm653_vm11, %v655_v56, %v651_v30  ;;  %v901_v41 = vmul.f32 %v1229_v0, %v900_v3  ;;  %v910_v6 = vor.u32 1.1754944e-38, %v909_v25  ;;  %vm889_vm15 = vweird.f32 %v1231_v24 }
 0x1e2   :  { %v657_v62 = vmul.f32 %v1684_v23, %v656_v26  ;;  %v885_v21 = vsub.f32 1.0, %v884_v57  ;;  %v1233_v35 = vpop.eup %1232  ;;  %vm908_vm0 = vcmp.eq.f32.partialorder %v907_v8, 8.507059e+37  ;;  %vm888_vm2 = vweird.f32 %v2106_v18 }
 0x1e3   :  { %v902_v22 = vadd.f32 %v1229_v0, %v901_v41  ;;  %v779_v11 = vmul.f32 %v1233_v35, %v2132_v48  ;;  %vm893_vm3 = vcmp.eq.f32.partialorder %v892_v13, 8.507059e+37  ;;  %v895_v17 = vor.u32 1.1754944e-38, %v894_v14  ;;  %vm890_vm4 = vmor %vm888_vm2, %vm889_vm15  ;;  %v2174_v42 = vpop.xlane.xlu0 %551 }
 0x1e4   :  { %1039 = vst.msk [vmem:[%s2231_s3 + $0x30] sm:$0xff] %vm264_vm1, %v657_v62  ;;  %v886_v34 = vmul.f32 %v1231_v24, %v885_v21  ;;  %v1235_v49 = vpop.eup %1234  ;;  %vm783_vm5 = vweird.f32 %v2132_v48  ;;  %v787_v18 = vand.u32 2147483647, %v2132_v48  ;;  %v789_v33 = vand.u32 2147483648, %v2132_v48 }
 0x1e5   :  { %v906_v23 = vsel %vm905_vm14, %v1229_v0, %v902_v22  ;;  %v780_v46 = vsub.f32 1.0, %v779_v11  ;;  %v989_v37 = vmul.f32 %v1235_v49, %v2136_v63  ;;  %1238 = vrcp.f32 %v2166_v44 }
 0x1e6   :  { %v911_v43 = vsel %vm908_vm0, %v910_v6, %v906_v23  ;;  %v887_v31 = vadd.f32 %v1231_v24, %v886_v34  ;;  %v1237_v1 = vpop.eup %1236  ;;  %vm784_vm6 = vweird.f32 %v1233_v35  ;;  %v997_v59 = vand.u32 2147483647, %v2136_v63 }
 0x1e7   :  { %v912_v36 = vmul.f32 %v1700_v40, %v911_v43  ;;  %v781_v15 = vmul.f32 %v1233_v35, %v780_v46  ;;  %v990_v28 = vsub.f32 1.0, %v989_v37  ;;  %v999_v60 = vand.u32 2147483648, %v2136_v63  ;;  %vm785_vm8 = vmor %vm783_vm5, %vm784_vm6 }
 0x1e8   :  { %v891_v4 = vsel %vm890_vm4, %v1231_v24, %v887_v31  ;;  %v659_v32 = vmul.f32 %v1237_v1, %v2145_v27  ;;  %vm994_vm7 = vweird.f32 %v1235_v49  ;;  %1240 = vrcp.f32 %v2174_v42 }
 0x1e9   :  { %1056 = vst.msk [vmem:[%s2231_s3 + $0xb8] sm:$0xff] %vm264_vm1, %v912_v36  ;;  %v896_v40 = vsel %vm893_vm3, %v895_v17, %v891_v4  ;;  %v782_v9 = vadd.f32 %v1233_v35, %v781_v15  ;;  %v991_v55 = vmul.f32 %v1235_v49, %v990_v28  ;;  %vm788_vm9 = vcmp.eq.f32.partialorder %v787_v18, 8.507059e+37 }
 0x1ea   :  { %v897_v12 = vmul.f32 %v1698_v39, %v896_v40  ;;  %v790_v39 = vor.u32 1.1754944e-38, %v789_v33  ;;  %vm993_vm10 = vweird.f32 %v2136_v63  ;;  %v660_v29 = vsub.f32 1.0, %v659_v32 }
 0x1eb   :  { %v786_v5 = vsel %vm785_vm8, %v1233_v35, %v782_v9  ;;  %v992_v50 = vadd.f32 %v1235_v49, %v991_v55  ;;  %v667_v19 = vand.u32 2147483647, %v2145_v27  ;;  %v669_v54 = vand.u32 2147483648, %v2145_v27  ;;  %v1239_v53 = vpop.eup %1238  ;;  %vm995_vm11 = vmor %vm993_vm10, %vm994_vm7 }
 0x1ec   :  { %1055 = vst.msk [vmem:[%s2231_s3 + $0xb0] sm:$0xff] %vm264_vm1, %v897_v12  ;;  %v791_v0 = vsel %vm788_vm9, %v790_v39, %v786_v5  ;;  %v1000_v58 = vor.u32 1.1754944e-38, %v999_v60  ;;  %v661_v10 = vmul.f32 %v1237_v1, %v660_v29  ;;  %vm664_vm12 = vweird.f32 %v1237_v1 }
 0x1ed   :  { %v792_v48 = vmul.f32 %v1705_v45, %v791_v0  ;;  %v996_v61 = vsel %vm995_vm11, %v1235_v49, %v992_v50  ;;  %vm998_vm13 = vcmp.eq.f32.partialorder %v997_v59, 8.507059e+37  ;;  %v1004_v7 = vmul.f32 %v1239_v53, %v2166_v44 }
 0x1ee   :  { %v1001_v51 = vsel %vm998_vm13, %v1000_v58, %v996_v61  ;;  %v662_v63 = vadd.f32 %v1237_v1, %v661_v10  ;;  %vm663_vm14 = vweird.f32 %v2145_v27  ;;  %v1241_v38 = vpop.eup %1240  ;;  %v670_v24 = vor.u32 1.1754944e-38, %v669_v54 }
 0x1ef   :  { %1048 = vst.msk [vmem:[%s2231_s3 + $0x78] sm:$0xff] %vm264_vm1, %v792_v48  ;;  %v1002_v52 = vmul.f32 %v1711_v2, %v1001_v51  ;;  %vm665_vm15 = vmor %vm663_vm14, %vm664_vm12  ;;  %v1005_v56 = vsub.f32 1.0, %v1004_v7  ;;  %vm668_vm0 = vcmp.eq.f32.partialorder %v667_v19, 8.507059e+37  ;;  %v1014_v3 = vand.u32 2147483648, %v2166_v44 }
 0x1f0   :  { %v666_v45 = vsel %vm665_vm15, %v1237_v1, %v662_v63  ;;  %v1019_v30 = vmul.f32 %v1241_v38, %v2174_v42  ;;  %vm1009_vm2 = vweird.f32 %v1239_v53  ;;  %v1012_v57 = vand.u32 2147483647, %v2166_v44 }
 0x1f1   :  { %1062 = vst.msk [vmem:[%s2231_s3 + $0xe8] sm:$0xff] %vm264_vm1, %v1002_v52  ;;  %v671_v27 = vsel %vm668_vm0, %v670_v24, %v666_v45  ;;  %v1006_v25 = vmul.f32 %v1239_v53, %v1005_v56  ;;  %vm1008_vm3 = vweird.f32 %v2166_v44  ;;  %v1029_v8 = vand.u32 2147483648, %v2174_v42 }
 0x1f2   :  { %v672_v2 = vmul.f32 %v1713_v16, %v671_v27  ;;  %v1020_v26 = vsub.f32 1.0, %v1019_v30  ;;  %vm1010_vm4 = vmor %vm1008_vm3, %vm1009_vm2  ;;  %v1015_v62 = vor.u32 1.1754944e-38, %v1014_v3  ;;  %vm1024_vm5 = vweird.f32 %v1241_v38 }
 0x1f3   :  { %v1007_v41 = vadd.f32 %v1239_v53, %v1006_v25  ;;  %v1027_v13 = vand.u32 2147483647, %v2174_v42  ;;  %vm1013_vm6 = vcmp.eq.f32.partialorder %v1012_v57, 8.507059e+37  ;;  %vm1023_vm7 = vweird.f32 %v2174_v42 }
 0x1f4   :  { %1040 = vst.msk [vmem:[%s2231_s3 + $0x38] sm:$0xff] %vm264_vm1, %v672_v2  ;;  %v1021_v21 = vmul.f32 %v1241_v38, %v1020_v26  ;;  %vm1025_vm8 = vmor %vm1023_vm7, %vm1024_vm5  ;;  %v1030_v6 = vor.u32 1.1754944e-38, %v1029_v8 }
 0x1f5   :  { %v1011_v14 = vsel %vm1010_vm4, %v1239_v53, %v1007_v41  ;;  %vm1028_vm9 = vcmp.eq.f32.partialorder %v1027_v13, 8.507059e+37 }
 0x1f6   :  { %v1016_v16 = vsel %vm1013_vm6, %v1015_v62, %v1011_v14  ;;  %v1022_v22 = vadd.f32 %v1241_v38, %v1021_v21 }
 0x1f7   :  { %v1017_v35 = vmul.f32 %v1715_v20, %v1016_v16 }
 0x1f8   :  { %v1026_v34 = vsel %vm1025_vm8, %v1241_v38, %v1022_v22 }
 0x1f9   :  { %1063 = vst.msk [vmem:[%s2231_s3 + $0xf0] sm:$0xff] %vm264_vm1, %v1017_v35  ;;  %v1031_v23 = vsel %vm1028_vm9, %v1030_v6, %v1026_v34 }
 0x1fa   :  { %v1032_v11 = vmul.f32 %v1723_v47, %v1031_v23 }
 0x1fc   :  { %1064 = vst.msk [vmem:[%s2231_s3 + $0xf8] sm:$0xff] %vm264_vm1, %v1032_v11 }

</bundles_post_ra>
